<compile_context>
chip_gen: v7x
topology: tpu7x:2x2x1
jax: 0.10.0
libtpu: 0.0.40
codegen_flags: <defaults>
</compile_context>

<pallas_src>
import functools

import jax
import jax.numpy as jnp
from jax.experimental import pallas as pl
from jax.experimental.pallas import tpu as pltpu


# ---------------------------------------------------------------------------
# Kernels
# ---------------------------------------------------------------------------

def _tversky_dense_kernel(p_ref, t_ref, tp_ref, sp_ref, st_ref, *, rows_rem):
    """Dense-layout kernel.

    Blocks:  p_ref/t_ref : (1, tR, 128) native dtype (spatial rows x lanes)
             tp/sp/st    : (1, 8, 128)  f32 lane-wide accumulators (one vreg).
    Grid:    (N*C, row_tiles); the row_tiles axis is the reduction.
    """
    k = pl.program_id(1)

    @pl.when(k == 0)
    def _init():
        tp_ref[...] = jnp.zeros_like(tp_ref)
        sp_ref[...] = jnp.zeros_like(sp_ref)
        st_ref[...] = jnp.zeros_like(st_ref)

    # Native dtype -> f32 on the VPU inside the kernel (single HBM read).
    p = p_ref[0].astype(jnp.float32)       # (tR, 128)
    t = t_ref[0].astype(jnp.float32)       # (tR, 128)
    tr = p.shape[0]

    def _accum(pp, tt):
        # Regroup rows into whole (8, 128) vregs: the reduction over axis 0 is
        # pure VPU vector adds (no XLU cross-lane work in the hot loop) and the
        # accumulator stores are full-vreg, unmasked.
        pv = pp.reshape(tr // 8, 8, 128)
        tv = tt.reshape(tr // 8, 8, 128)
        tp_ref[0] += jnp.sum(pv * tv, axis=0)
        sp_ref[0] += jnp.sum(pv, axis=0)
        st_ref[0] += jnp.sum(tv, axis=0)

    if rows_rem == 0:
        _accum(p, t)
    else:
        last = pl.num_programs(1) - 1

        @pl.when(k != last)
        def _full_tile():
            _accum(p, t)

        @pl.when(k == last)
        def _ragged_tile():
            # Rows past the true extent hold unspecified boundary data; mask
            # them to zero BEFORE any arithmetic.
            row = jax.lax.broadcasted_iota(jnp.int32, p.shape, 0)
            m = row < rows_rem
            _accum(jnp.where(m, p, 0.0), jnp.where(m, t, 0.0))


def _tversky_flat_kernel(p_ref, t_ref, tp_ref, sp_ref, st_ref, *, lanes_rem):
    """Fallback kernel for ragged / tiny spatial sizes (S % 128 != 0).

    Blocks:  p_ref/t_ref : (N*C, tS) native dtype
             tp/sp/st    : (N*C, 1)  f32 accumulators.
    Grid:    (spatial_tiles,).  Still a single HBM read per tensor.
    """
    k = pl.program_id(0)

    @pl.when(k == 0)
    def _init():
        tp_ref[...] = jnp.zeros_like(tp_ref)
        sp_ref[...] = jnp.zeros_like(sp_ref)
        st_ref[...] = jnp.zeros_like(st_ref)

    p = p_ref[...].astype(jnp.float32)     # (NC, tS)
    t = t_ref[...].astype(jnp.float32)

    def _accum(pp, tt):
        tp_ref[...] += jnp.sum(pp * tt, axis=-1, keepdims=True)
        sp_ref[...] += jnp.sum(pp, axis=-1, keepdims=True)
        st_ref[...] += jnp.sum(tt, axis=-1, keepdims=True)

    if lanes_rem == 0:
        _accum(p, t)
    else:
        last = pl.num_programs(0) - 1

        @pl.when(k != last)
        def _full_tile():
            _accum(p, t)

        @pl.when(k == last)
        def _ragged_tile():
            lane = jax.lax.broadcasted_iota(jnp.int32, p.shape, 1)
            m = lane < lanes_rem
            _accum(jnp.where(m, p, 0.0), jnp.where(m, t, 0.0))


# ---------------------------------------------------------------------------
# Tile sizing (generation- and dtype-aware)
# ---------------------------------------------------------------------------

def _vmem_capacity_bytes():
    """Physical VMEM of the current chip (128 MiB v5e/v6e, 64 MiB v7x)."""
    try:
        return int(pltpu.get_tpu_info().vmem_capacity_bytes)
    except Exception:
        return 64 * 1024 * 1024            # conservative (v7x-sized) fallback


def _pick_row_tile(rows, item_p, item_t, budget_bytes):
    """Rows-of-128 per grid step for the dense kernel, sized to VMEM."""
    # Per row of 128 elems: double-buffered inputs + ~3 f32 in-kernel temps
    # (cast p, cast t, product).
    per_row = 128 * (2 * item_p + 2 * item_t + 3 * 4)
    tr = budget_bytes // per_row
    tr = max(8, (tr // 8) * 8)
    tr = min(tr, 8192)                     # keep per-step temporaries modest
    tr = min(tr, max(8, (rows // 8) * 8))  # never exceed the row count
    return int(tr)


def _pick_lane_tile(spatial, nc, item_p, item_t, budget_bytes):
    """Lane tile for the fallback kernel, sized to VMEM."""
    if spatial <= 128:
        return int(spatial)                # block == full dim (legal, no mask)
    nc_pad = -(-nc // 8) * 8               # sublane padding of the N*C axis
    per_lane = nc_pad * (2 * item_p + 2 * item_t + 3 * 4)
    ts = budget_bytes // per_lane
    ts = max(128, (ts // 128) * 128)
    ts = min(ts, (spatial // 128) * 128)
    return int(ts)


# ---------------------------------------------------------------------------
# Wrapper
# ---------------------------------------------------------------------------

def tversky_loss(pred, target, *, block_rows=None, block_lanes=None):
    """Pallas TverskyLoss forward.  pred/target: (N, C, *spatial) arrays."""
    smooth = 1.0
    # Mimic torch `target.squeeze(0)` when trailing dims disagree.
    if pred.shape[1:] != target.shape[1:] and target.shape[0] == 1:
        target = target[0]
    if target.ndim != pred.ndim or pred.shape[1] != target.shape[1]:
        raise ValueError("pred and target must have the same number of channels")
    if target.shape != pred.shape:
        raise ValueError(
            f"pred {pred.shape} and target {target.shape} must match after squeeze")

    N, C = pred.shape[0], pred.shape[1]
    NC = N * C
    spatial = 1
    for d in pred.shape[2:]:
        spatial *= d

    vmem_cap = _vmem_capacity_bytes()
    budget = vmem_cap // 4                 # input pipeline buffers + f32 temps
    vmem_limit = (vmem_cap // 4) * 3       # explicit headroom below physical
    item_p = jnp.dtype(pred.dtype).itemsize
    item_t = jnp.dtype(target.dtype).itemsize

    if spatial % 128 == 0 and spatial >= 8 * 128:
        # ---- dense path: spatial on sublanes AND lanes ---------------------
        rows = spatial // 128
        p3 = jnp.reshape(pred, (NC, rows, 128))     # metadata-only reshapes
        t3 = jnp.reshape(target, (NC, rows, 128))

        tr = block_rows if block_rows is not None else _pick_row_tile(
            rows, item_p, item_t, budget)
        n_row_blocks = pl.cdiv(rows, tr)
        rows_rem = rows % tr

        out_sd = jax.ShapeDtypeStruct((NC, 8, 128), jnp.float32)
        out_spec = pl.BlockSpec((1, 8, 128), lambda i, k: (i, 0, 0))
        in_spec = pl.BlockSpec((1, tr, 128), lambda i, k: (i, k, 0))

        tp_p, sp_p, st_p = pl.pallas_call(
            functools.partial(_tversky_dense_kernel, rows_rem=rows_rem),
            out_shape=(out_sd, out_sd, out_sd),
            grid_spec=pltpu.PrefetchScalarGridSpec(
                num_scalar_prefetch=0,
                grid=(NC, n_row_blocks),
                in_specs=[in_spec, in_spec],
                out_specs=(out_spec, out_spec, out_spec)),
            compiler_params=pltpu.CompilerParams(
                dimension_semantics=("parallel", "arbitrary"),
                vmem_limit_bytes=vmem_limit),
        )(p3, t3)

        tp = jnp.sum(jnp.reshape(tp_p, (N, C, 8 * 128)), axis=-1)
        sp = jnp.sum(jnp.reshape(sp_p, (N, C, 8 * 128)), axis=-1)
        st = jnp.sum(jnp.reshape(st_p, (N, C, 8 * 128)), axis=-1)
    else:
        # ---- fallback: ragged / tiny spatial, lane-masked streaming --------
        p2 = jnp.reshape(pred, (NC, spatial))
        t2 = jnp.reshape(target, (NC, spatial))

        ts = block_lanes if block_lanes is not None else _pick_lane_tile(
            spatial, NC, item_p, item_t, budget)
        n_blocks = pl.cdiv(spatial, ts)
        lanes_rem = spatial % ts

        out_sd = jax.ShapeDtypeStruct((NC, 1), jnp.float32)
        out_spec = pl.BlockSpec((NC, 1), lambda k: (0, 0))
        in_spec = pl.BlockSpec((NC, ts), lambda k: (0, k))

        tp_p, sp_p, st_p = pl.pallas_call(
            functools.partial(_tversky_flat_kernel, lanes_rem=lanes_rem),
            out_shape=(out_sd, out_sd, out_sd),
            grid_spec=pltpu.PrefetchScalarGridSpec(
                num_scalar_prefetch=0,
                grid=(n_blocks,),
                in_specs=[in_spec, in_spec],
                out_specs=(out_spec, out_spec, out_spec)),
            compiler_params=pltpu.CompilerParams(
                dimension_semantics=("arbitrary",),
                vmem_limit_bytes=vmem_limit),
        )(p2, t2)

        tp = jnp.reshape(tp_p, (N, C))
        sp = jnp.reshape(sp_p, (N, C))
        st = jnp.reshape(st_p, (N, C))

    # Tiny O(N*C) epilogue.  Exact simplification of the Tversky denominator:
    #   tp + 0.3*(sp - tp) + 0.7*(st - tp) + smooth == 0.3*sp + 0.7*st + smooth
    # -> no fp/fn subtraction, no cancellation.
    denom = 0.3 * sp + 0.7 * st + smooth
    dice = jnp.sum(tp / denom, axis=1) / C
    return jnp.clip(jnp.mean(1.0 - dice), 0.0, 2.0)


def tversky_loss_ref(pred, target):
    """Pure-JAX reference mirroring the PyTorch module."""
    smooth = 1.0
    if pred.shape[1:] != target.shape[1:] and target.shape[0] == 1:
        target = target[0]
    N, C = pred.shape[0], pred.shape[1]
    p = jnp.reshape(pred, (N, C, -1)).astype(jnp.float32)
    t = jnp.reshape(target, (N, C, -1)).astype(jnp.float32)
    tp = jnp.sum(p * t, axis=-1)
    fp = jnp.sum(p * (1.0 - t), axis=-1)
    fn = jnp.sum((1.0 - p) * t, axis=-1)
    dice = jnp.sum(tp / (tp + 0.3 * fp + 0.7 * fn + smooth), axis=1) / C
    return jnp.clip(jnp.mean(1.0 - dice), 0.0, 2.0)


if __name__ == "__main__":
    key = jax.random.PRNGKey(0)
    k1, k2, k3, k4, k5, k6 = jax.random.split(key, 6)

    # Case 1: bf16, dense path with multiple row blocks and a ragged row tile
    #         (S = 4*34*32 = 4352 = 34*128; block_rows=8 -> 5 blocks, rem 2).
    shape1 = (2, 3, 4, 34, 32)
    pred1 = jax.nn.sigmoid(jax.random.normal(k1, shape1)).astype(jnp.bfloat16)
    targ1 = (jax.random.uniform(k2, shape1) > 0.5).astype(jnp.bfloat16)
    loss1 = jax.block_until_ready(tversky_loss(pred1, targ1, block_rows=8))
    ref1 = jax.block_until_ready(tversky_loss_ref(pred1, targ1))
    assert jnp.isfinite(loss1), "case 1: non-finite loss"
    assert abs(float(loss1) - float(ref1)) < 1e-5, ("case1", float(loss1), float(ref1))

    # Case 2: f32, dense path with the default VMEM-derived row tile
    #         (S = 2*4*128 = 1024, rows = 8, single row block, no masking).
    shape2 = (1, 4, 2, 4, 128)
    pred2 = jax.nn.sigmoid(jax.random.normal(k3, shape2, jnp.float32))
    targ2 = (jax.random.uniform(k4, shape2) > 0.5).astype(jnp.float32)
    loss2 = jax.block_until_ready(tversky_loss(pred2, targ2))
    ref2 = jax.block_until_ready(tversky_loss_ref(pred2, targ2))
    assert jnp.isfinite(loss2), "case 2: non-finite loss"
    assert abs(float(loss2) - float(ref2)) < 1e-5, ("case2", float(loss2), float(ref2))

    # Case 3: f32, ragged spatial size (S = 3*7*13 = 273) -> fallback kernel
    #         with a masked last lane tile (256 full + 17 masked).
    shape3 = (2, 3, 3, 7, 13)
    pred3 = jax.nn.sigmoid(jax.random.normal(k5, shape3, jnp.float32))
    targ3 = (jax.random.uniform(k6, shape3) > 0.5).astype(jnp.float32)
    loss3 = jax.block_until_ready(tversky_loss(pred3, targ3))
    ref3 = jax.block_until_ready(tversky_loss_ref(pred3, targ3))
    assert jnp.isfinite(loss3), "case 3: non-finite loss"
    assert abs(float(loss3) - float(ref3)) < 1e-5, ("case3", float(loss3), float(ref3))

    print("KERNEL_OK")
</pallas_src>

<mosaic_0001>
module attributes {stable_mosaic.version = 11 : i64} {
  func.func @_tversky_dense_kernel(%arg0: i32, %arg1: i32, %arg2: memref<1x8x128xbf16, #tpu.memory_space<vmem>>, %arg3: memref<1x8x128xbf16, #tpu.memory_space<vmem>>, %arg4: memref<1x8x128xf32, #tpu.memory_space<vmem>>, %arg5: memref<1x8x128xf32, #tpu.memory_space<vmem>>, %arg6: memref<1x8x128xf32, #tpu.memory_space<vmem>>) attributes {dimension_semantics = [#tpu.dimension_semantics<parallel>, #tpu.dimension_semantics<arbitrary>], iteration_bounds = array<i64: 6, 5>, scalar_prefetch = 0 : i64, scratch_operands = 0 : i64, tpu.core_type = #tpu.core_type<tc>, window_params = [{transform_indices = @transform_0, window_bounds = array<i64: 1, 8, 128>}, {transform_indices = @transform_1, window_bounds = array<i64: 1, 8, 128>}, {transform_indices = @transform_2, window_bounds = array<i64: 1, 8, 128>}, {transform_indices = @transform_3, window_bounds = array<i64: 1, 8, 128>}, {transform_indices = @transform_4, window_bounds = array<i64: 1, 8, 128>}]} {
    %c0_i32 = arith.constant 0 : i32
    %0 = arith.cmpi eq, %arg1, %c0_i32 : i32
    %1 = arith.extui %0 : i1 to i32
    %c0_i32_0 = arith.constant 0 : i32
    %2 = arith.cmpi ne, %1, %c0_i32_0 : i32
    scf.if %2 {
      %cst = arith.constant 0.000000e+00 : f32
      %15 = vector.broadcast %cst : f32 to vector<1x8x128xf32>
      %c0_9 = arith.constant 0 : index
      %c0_10 = arith.constant 0 : index
      %c0_11 = arith.constant 0 : index
      %16 = vector.load %arg4[%c0_9, %c0_10, %c0_11] : memref<1x8x128xf32, #tpu.memory_space<vmem>>, vector<1x8x128xf32>
      tpu.vector_store %arg4[%c0_9, %c0_10, %c0_11], %15 {strides = array<i32>} : memref<1x8x128xf32, #tpu.memory_space<vmem>>, vector<1x8x128xf32>,
      %cst_12 = arith.constant 0.000000e+00 : f32
      %17 = vector.broadcast %cst_12 : f32 to vector<1x8x128xf32>
      %c0_13 = arith.constant 0 : index
      %c0_14 = arith.constant 0 : index
      %c0_15 = arith.constant 0 : index
      %18 = vector.load %arg5[%c0_13, %c0_14, %c0_15] : memref<1x8x128xf32, #tpu.memory_space<vmem>>, vector<1x8x128xf32>
      tpu.vector_store %arg5[%c0_13, %c0_14, %c0_15], %17 {strides = array<i32>} : memref<1x8x128xf32, #tpu.memory_space<vmem>>, vector<1x8x128xf32>,
      %cst_16 = arith.constant 0.000000e+00 : f32
      %19 = vector.broadcast %cst_16 : f32 to vector<1x8x128xf32>
      %c0_17 = arith.constant 0 : index
      %c0_18 = arith.constant 0 : index
      %c0_19 = arith.constant 0 : index
      %20 = vector.load %arg6[%c0_17, %c0_18, %c0_19] : memref<1x8x128xf32, #tpu.memory_space<vmem>>, vector<1x8x128xf32>
      tpu.vector_store %arg6[%c0_17, %c0_18, %c0_19], %19 {strides = array<i32>} : memref<1x8x128xf32, #tpu.memory_space<vmem>>, vector<1x8x128xf32>,
    } else {
    }
    %c0 = arith.constant 0 : index
    %c0_1 = arith.constant 0 : index
    %c0_2 = arith.constant 0 : index
    %3 = vector.load %arg2[%c0, %c0_1, %c0_2] : memref<1x8x128xbf16, #tpu.memory_space<vmem>>, vector<1x8x128xbf16>
    %4 = vector.shape_cast %3 : vector<1x8x128xbf16> to vector<8x128xbf16>
    %5 = arith.extf %4 : vector<8x128xbf16> to vector<8x128xf32>
    %c0_3 = arith.constant 0 : index
    %c0_4 = arith.constant 0 : index
    %c0_5 = arith.constant 0 : index
    %6 = vector.load %arg3[%c0_3, %c0_4, %c0_5] : memref<1x8x128xbf16, #tpu.memory_space<vmem>>, vector<1x8x128xbf16>
    %7 = vector.shape_cast %6 : vector<1x8x128xbf16> to vector<8x128xbf16>
    %8 = arith.extf %7 : vector<8x128xbf16> to vector<8x128xf32>
    %c4_i32 = arith.constant 4 : i32
    %9 = arith.cmpi ne, %arg1, %c4_i32 : i32
    %10 = arith.extui %9 : i1 to i32
    %c0_i32_6 = arith.constant 0 : i32
    %11 = arith.cmpi ne, %10, %c0_i32_6 : i32
    scf.if %11 {
      %15 = vector.shape_cast %5 : vector<8x128xf32> to vector<1x8x128xf32>
      %16 = vector.shape_cast %8 : vector<8x128xf32> to vector<1x8x128xf32>
      %c0_9 = arith.constant 0 : index
      %c0_10 = arith.constant 0 : index
      %c0_11 = arith.constant 0 : index
      %17 = vector.load %arg4[%c0_9, %c0_10, %c0_11] : memref<1x8x128xf32, #tpu.memory_space<vmem>>, vector<1x8x128xf32>
      %18 = vector.shape_cast %17 : vector<1x8x128xf32> to vector<8x128xf32>
      %19 = arith.mulf %15, %16 : vector<1x8x128xf32>
      %cst = arith.constant dense<0.000000e+00> : vector<8x128xf32>
      %20 = vector.multi_reduction <add>, %19, %cst [0] : vector<1x8x128xf32> to vector<8x128xf32>
      %21 = arith.addf %18, %20 : vector<8x128xf32>
      %c0_12 = arith.constant 0 : index
      %c0_13 = arith.constant 0 : index
      %c0_14 = arith.constant 0 : index
      %22 = vector.load %arg4[%c0_12, %c0_13, %c0_14] : memref<1x8x128xf32, #tpu.memory_space<vmem>>, vector<1x8x128xf32>
      %23 = vector.shape_cast %22 : vector<1x8x128xf32> to vector<8x128xf32>
      %24 = vector.shape_cast %21 : vector<8x128xf32> to vector<1x8x128xf32>
      tpu.vector_store %arg4[%c0_12, %c0_13, %c0_14], %24 {strides = array<i32>} : memref<1x8x128xf32, #tpu.memory_space<vmem>>, vector<1x8x128xf32>,
      %c0_15 = arith.constant 0 : index
      %c0_16 = arith.constant 0 : index
      %c0_17 = arith.constant 0 : index
      %25 = vector.load %arg5[%c0_15, %c0_16, %c0_17] : memref<1x8x128xf32, #tpu.memory_space<vmem>>, vector<1x8x128xf32>
      %26 = vector.shape_cast %25 : vector<1x8x128xf32> to vector<8x128xf32>
      %cst_18 = arith.constant dense<0.000000e+00> : vector<8x128xf32>
      %27 = vector.multi_reduction <add>, %15, %cst_18 [0] : vector<1x8x128xf32> to vector<8x128xf32>
      %28 = arith.addf %26, %27 : vector<8x128xf32>
      %c0_19 = arith.constant 0 : index
      %c0_20 = arith.constant 0 : index
      %c0_21 = arith.constant 0 : index
      %29 = vector.load %arg5[%c0_19, %c0_20, %c0_21] : memref<1x8x128xf32, #tpu.memory_space<vmem>>, vector<1x8x128xf32>
      %30 = vector.shape_cast %29 : vector<1x8x128xf32> to vector<8x128xf32>
      %31 = vector.shape_cast %28 : vector<8x128xf32> to vector<1x8x128xf32>
      tpu.vector_store %arg5[%c0_19, %c0_20, %c0_21], %31 {strides = array<i32>} : memref<1x8x128xf32, #tpu.memory_space<vmem>>, vector<1x8x128xf32>,
      %c0_22 = arith.constant 0 : index
      %c0_23 = arith.constant 0 : index
      %c0_24 = arith.constant 0 : index
      %32 = vector.load %arg6[%c0_22, %c0_23, %c0_24] : memref<1x8x128xf32, #tpu.memory_space<vmem>>, vector<1x8x128xf32>
      %33 = vector.shape_cast %32 : vector<1x8x128xf32> to vector<8x128xf32>
      %cst_25 = arith.constant dense<0.000000e+00> : vector<8x128xf32>
      %34 = vector.multi_reduction <add>, %16, %cst_25 [0] : vector<1x8x128xf32> to vector<8x128xf32>
      %35 = arith.addf %33, %34 : vector<8x128xf32>
      %c0_26 = arith.constant 0 : index
      %c0_27 = arith.constant 0 : index
      %c0_28 = arith.constant 0 : index
      %36 = vector.load %arg6[%c0_26, %c0_27, %c0_28] : memref<1x8x128xf32, #tpu.memory_space<vmem>>, vector<1x8x128xf32>
      %37 = vector.shape_cast %36 : vector<1x8x128xf32> to vector<8x128xf32>
      %38 = vector.shape_cast %35 : vector<8x128xf32> to vector<1x8x128xf32>
      tpu.vector_store %arg6[%c0_26, %c0_27, %c0_28], %38 {strides = array<i32>} : memref<1x8x128xf32, #tpu.memory_space<vmem>>, vector<1x8x128xf32>,
    } else {
    }
    %c4_i32_7 = arith.constant 4 : i32
    %12 = arith.cmpi eq, %arg1, %c4_i32_7 : i32
    %13 = arith.extui %12 : i1 to i32
    %c0_i32_8 = arith.constant 0 : i32
    %14 = arith.cmpi ne, %13, %c0_i32_8 : i32
    scf.if %14 {
      %15 = tpu.iota {dimensions = array<i32: 0>} : vector<8x128xi32>
      %c2_i32 = arith.constant 2 : i32
      %16 = vector.broadcast %c2_i32 : i32 to vector<8x128xi32>
      %17 = arith.cmpi slt, %15, %16 : vector<8x128xi32>
      %cst = arith.constant 0.000000e+00 : f32
      %18 = vector.broadcast %cst : f32 to vector<8x128xf32>
      %19 = arith.select %17, %5, %18 : vector<8x128xi1>, vector<8x128xf32>
      %cst_9 = arith.constant 0.000000e+00 : f32
      %20 = vector.broadcast %cst_9 : f32 to vector<8x128xf32>
      %21 = arith.select %17, %8, %20 : vector<8x128xi1>, vector<8x128xf32>
      %22 = vector.shape_cast %19 : vector<8x128xf32> to vector<1x8x128xf32>
      %23 = vector.shape_cast %21 : vector<8x128xf32> to vector<1x8x128xf32>
      %c0_10 = arith.constant 0 : index
      %c0_11 = arith.constant 0 : index
      %c0_12 = arith.constant 0 : index
      %24 = vector.load %arg4[%c0_10, %c0_11, %c0_12] : memref<1x8x128xf32, #tpu.memory_space<vmem>>, vector<1x8x128xf32>
      %25 = vector.shape_cast %24 : vector<1x8x128xf32> to vector<8x128xf32>
      %26 = arith.mulf %22, %23 : vector<1x8x128xf32>
      %cst_13 = arith.constant dense<0.000000e+00> : vector<8x128xf32>
      %27 = vector.multi_reduction <add>, %26, %cst_13 [0] : vector<1x8x128xf32> to vector<8x128xf32>
      %28 = arith.addf %25, %27 : vector<8x128xf32>
      %c0_14 = arith.constant 0 : index
      %c0_15 = arith.constant 0 : index
      %c0_16 = arith.constant 0 : index
      %29 = vector.load %arg4[%c0_14, %c0_15, %c0_16] : memref<1x8x128xf32, #tpu.memory_space<vmem>>, vector<1x8x128xf32>
      %30 = vector.shape_cast %29 : vector<1x8x128xf32> to vector<8x128xf32>
      %31 = vector.shape_cast %28 : vector<8x128xf32> to vector<1x8x128xf32>
      tpu.vector_store %arg4[%c0_14, %c0_15, %c0_16], %31 {strides = array<i32>} : memref<1x8x128xf32, #tpu.memory_space<vmem>>, vector<1x8x128xf32>,
      %c0_17 = arith.constant 0 : index
      %c0_18 = arith.constant 0 : index
      %c0_19 = arith.constant 0 : index
      %32 = vector.load %arg5[%c0_17, %c0_18, %c0_19] : memref<1x8x128xf32, #tpu.memory_space<vmem>>, vector<1x8x128xf32>
      %33 = vector.shape_cast %32 : vector<1x8x128xf32> to vector<8x128xf32>
      %cst_20 = arith.constant dense<0.000000e+00> : vector<8x128xf32>
      %34 = vector.multi_reduction <add>, %22, %cst_20 [0] : vector<1x8x128xf32> to vector<8x128xf32>
      %35 = arith.addf %33, %34 : vector<8x128xf32>
      %c0_21 = arith.constant 0 : index
      %c0_22 = arith.constant 0 : index
      %c0_23 = arith.constant 0 : index
      %36 = vector.load %arg5[%c0_21, %c0_22, %c0_23] : memref<1x8x128xf32, #tpu.memory_space<vmem>>, vector<1x8x128xf32>
      %37 = vector.shape_cast %36 : vector<1x8x128xf32> to vector<8x128xf32>
      %38 = vector.shape_cast %35 : vector<8x128xf32> to vector<1x8x128xf32>
      tpu.vector_store %arg5[%c0_21, %c0_22, %c0_23], %38 {strides = array<i32>} : memref<1x8x128xf32, #tpu.memory_space<vmem>>, vector<1x8x128xf32>,
      %c0_24 = arith.constant 0 : index
      %c0_25 = arith.constant 0 : index
      %c0_26 = arith.constant 0 : index
      %39 = vector.load %arg6[%c0_24, %c0_25, %c0_26] : memref<1x8x128xf32, #tpu.memory_space<vmem>>, vector<1x8x128xf32>
      %40 = vector.shape_cast %39 : vector<1x8x128xf32> to vector<8x128xf32>
      %cst_27 = arith.constant dense<0.000000e+00> : vector<8x128xf32>
      %41 = vector.multi_reduction <add>, %23, %cst_27 [0] : vector<1x8x128xf32> to vector<8x128xf32>
      %42 = arith.addf %40, %41 : vector<8x128xf32>
      %c0_28 = arith.constant 0 : index
      %c0_29 = arith.constant 0 : index
      %c0_30 = arith.constant 0 : index
      %43 = vector.load %arg6[%c0_28, %c0_29, %c0_30] : memref<1x8x128xf32, #tpu.memory_space<vmem>>, vector<1x8x128xf32>
      %44 = vector.shape_cast %43 : vector<1x8x128xf32> to vector<8x128xf32>
      %45 = vector.shape_cast %42 : vector<8x128xf32> to vector<1x8x128xf32>
      tpu.vector_store %arg6[%c0_28, %c0_29, %c0_30], %45 {strides = array<i32>} : memref<1x8x128xf32, #tpu.memory_space<vmem>>, vector<1x8x128xf32>,
    } else {
    }
    return
  }
  func.func @transform_0(%arg0: i32, %arg1: i32) -> (i32, i32, i32) {
    %c0_i32 = arith.constant 0 : i32
    %c0_i32_0 = arith.constant 0 : i32
    return %arg0, %arg1, %c0_i32 : i32, i32, i32
  }
  func.func @transform_1(%arg0: i32, %arg1: i32) -> (i32, i32, i32) {
    %c0_i32 = arith.constant 0 : i32
    %c0_i32_0 = arith.constant 0 : i32
    return %arg0, %arg1, %c0_i32 : i32, i32, i32
  }
  func.func @transform_2(%arg0: i32, %arg1: i32) -> (i32, i32, i32) {
    %c0_i32 = arith.constant 0 : i32
    %c0_i32_0 = arith.constant 0 : i32
    %c0_i32_1 = arith.constant 0 : i32
    return %arg0, %c0_i32, %c0_i32_0 : i32, i32, i32
  }
  func.func @transform_3(%arg0: i32, %arg1: i32) -> (i32, i32, i32) {
    %c0_i32 = arith.constant 0 : i32
    %c0_i32_0 = arith.constant 0 : i32
    %c0_i32_1 = arith.constant 0 : i32
    return %arg0, %c0_i32, %c0_i32_0 : i32, i32, i32
  }
  func.func @transform_4(%arg0: i32, %arg1: i32) -> (i32, i32, i32) {
    %c0_i32 = arith.constant 0 : i32
    %c0_i32_0 = arith.constant 0 : i32
    %c0_i32_1 = arith.constant 0 : i32
    return %arg0, %c0_i32, %c0_i32_0 : i32, i32, i32
  }
}

</mosaic_0001>

<bundles_post_ra>
// kernel: tpu_custom_call.1
= control target key start
LH: loop header
LB: loop body
LE: loop exit
PB: predicated region body
PF: predicated region fallthrough
CT: control target
= control target key end

     0   :  { %s1348_s0 = inlined_call_operand.hbm [shape: bf16[6,34,128], index: 0, kind: input, shape index: {}]   ;;  %s1349_s1 = inlined_call_operand.hbm [shape: bf16[6,34,128], index: 1, kind: input, shape index: {}]   ;;  %s1350_s2 = inlined_call_operand.hbm [shape: f32[6,8,128], index: 2, kind: output, shape index: {0}]   ;;  %s1351_s3 = inlined_call_operand.hbm [shape: f32[6,8,128], index: 3, kind: output, shape index: {1}]   ;;  %s1352_s4 = inlined_call_operand.hbm [shape: f32[6,8,128], index: 4, kind: output, shape index: {2}]  }
   0x1   :  { %1362 = sst [smem:[#allocation20_spill]] %s1348_s0 }
   0x2   :  { %10 = vsyncpa [#allocation3], 0 }
   0x3   :  { %12 = vsyncpa [#allocation3 + $0x1], 0 }
   0x4   :  { %13 = vsyncpa [#allocation6], 0 }
   0x5   :  { %15 = vsyncpa [#allocation6 + $0x1], 0 }
   0x6   :  { %16 = vsyncpa [#allocation4], 0 }
   0x7   :  { %18 = vsyncpa [#allocation4 + $0x1], 0 }
   0x8   :  { %19 = vsyncpa [#allocation9], 0 }
   0x9   :  { %21 = vsyncpa [#allocation9 + $0x1], 0  ;;  %s981_s15 = smov 0   ;;  %s983_s16 = smov 0  }
   0xa   :  { %s985_s17 = smov 0   ;;  %s987_s18 = smov 0  }
   0xb   :  { %s989_s19 = smov 0   ;;  %s991_s20 = smov 0  }
   0xc   :  { %s993_s21 = smov 0   ;;  %s995_s22 = smov 0  }
   0xd   :  { %s997_s23 = smov 0   ;;  %s999_s24 = smov 0  }
   0xe   :  { %s1001_s25 = smov 0  }
   0xf LB: > { %1363 = sst [smem:[#allocation15_spill]] %s940_s23  ;;  %s1035_s26 = sadd.s32 4294967295, %s948_s25   ;;  %s948_s25 = sphi %s1001_s25, %s27_s25   ;;  %s944_s24 = sphi %s999_s24, %s1387_s24   ;;  %s940_s23 = sphi %s997_s23, %s1386_s23   ;;  %s936_s22 = sphi %s995_s22, %s1385_s22   ;;  %s932_s21 = sphi %s993_s21, %s1384_s21   ;;  %s928_s20 = sphi %s991_s20, %s1393_s20   ;;  %s924_s19 = sphi %s989_s19, %s1392_s19   ;;  %s920_s18 = sphi %s987_s18, %s1391_s18   ;;  %s916_s17 = sphi %s985_s17, %s1390_s17   ;;  %s912_s16 = sphi %s983_s16, %s1389_s16   ;;  %s908_s15 = sphi %s981_s15, %s1388_s15  }
  0x10   : > { %1364 = sst [smem:[#allocation16_spill]] %s944_s24  ;;  %s1353_s27 = sadd.s32 4294967294, %s948_s25  }
  0x11   : > { %s36_s28 = sadd.s32 1, %s940_s23  ;;  %s39_s29 = sadd.s32 1, %s944_s24 }
  0x12   : > { %p37_p0 = scmp.ge.s32.totalorder %s36_s28, 5  ;;  %s48_s30 = sadd.s32 1, %s928_s20 }
  0x13   : > { %p55_p1 = scmp.ne.s32.totalorder %s928_s20, %s924_s19  ;;  %p56_p2 = scmp.eq.s32.totalorder %s948_s25, 0 }
  0x14   : > { %s1395_s28 = smov (%p37_p0, %s36_s28), 0  ;;  %s1397_s29 = smov (!%p37_p0, %s39_s29), %s944_s24 }
  0x15   : > { %1365 = sst [smem:[#allocation17_spill]] %s1395_s28  ;;  %s44_s5 = ssub.s32 %s940_s23, %s1395_s28 }
  0x16   : > { %p1049_p3 = por %p56_p2, %p55_p1  ;;  %p41_p4 = scmp.ge.s32.totalorder %s1397_s29, 6 }
  0x17   : > { %p61_p5 = scmp.ne.s32.totalorder %s924_s19, %s920_s18  ;;  %p62_p6 = scmp.eq.s32.totalorder %s1035_s26, 0 }
  0x18   : > { %s102_s7 = sadd.s32 1, %s916_s17  ;;  %s1399_s29 = smov (%p41_p4, %s1397_s29), 0 }
  0x19   : > { %1367 = sst [smem:[#allocation18_spill]] %s1399_s29  ;;  %p1058_p7 = por %p62_p6, %p61_p5 }
  0x1a   : > { %p112_p8 = scmp.ne.s32.totalorder %s916_s17, %s912_s16  ;;  %s43_s9 = ssub.s32 %s944_s24, %s1399_s29 }
  0x1b   : > { %s1368_s8 = scalar_select %p1058_p7, 1, 0 }
  0x1c   : > { %p113_p9 = scmp.eq.s32.totalorder %s1035_s26, 29  ;;  %s45_s10 = sor.u32 %s44_s5, %s43_s9 }
  0x1d   : > { %p100_p10 = scmp.eq.s32.totalorder %s43_s9, 0  ;;  %p46_p11 = scmp.eq.s32.totalorder %s45_s10, 0 }
  0x1e   : > { %p1067_p12 = por %p113_p9, %p112_p8  ;;  %p118_p13 = scmp.ne.s32.totalorder %s912_s16, %s908_s15 }
  0x1f   : > { %s1072_s12 = scalar_select %p100_p10, %s916_s17, %s102_s7  }
  0x20   : > { %s1369_s11 = scalar_select %p1067_p12, 1, 0 }
  0x21   : > { %s1075_s13 = scalar_select %p46_p11, %s928_s20, %s48_s30  }
  0x22   : > { %p119_p0 = scmp.eq.s32.totalorder %s1353_s27, 29  ;;  %p611_p1 = scmp.lt.s32.totalorder %s948_s25, 30 }
  0x23   : > { %1370 = sst [smem:[#allocation19_spill]] %s1075_s13  ;;  %s1087_s18 = sand.u32 1, %s928_s20  }
  0x24   : > { %p1082_p2 = por %p119_p0, %p118_p13  ;;  %s1357_s5 = sshll.u32 %s1087_s18, 2 }
  0x25   : > { %s582_s9 = smul.u32 5, %s944_s24  ;;  %s195_s7 = scalar_lea.vmem [#allocation2], %s1357_s5 }
  0x26   : > { %s1371_s14 = scalar_select %p1082_p2, 1, 0 }
  0x27   : > { %s204_s10 = sshll.u32 %s195_s7, 4  ;;  %p1095_p4 = pnand %p611_p1, %p1049_p3  ;;  %s1102_s10 = int_to_ptr.vmem [resolvable:$true] %s204_s10 }
  0x28   : > { %s1100_s27 = sadd.s32 %s940_s23, %s582_s9  ;;  %s1373_s0 = sld [smem:[#allocation20_spill]] }
  0x29   : > { %s1359_s29 = sshll.u32 %s1100_s27, 6  ;;  %s192_s6 = scalar_lea.sflag [#allocation3], %s1087_s18 }
  0x2a   : > { %p704_p6 = pneg %p1095_p4 }
  0x2e   : > { %s1110_s5 = scalar_lea.hbm %s1373_s0, %s1359_s29  ;;  %s707_s24 = scalar_lea.hbm %s1373_s0, 1920 }
  0x2f   : > { %s702_s7 = scalar_lea.hbm %s1110_s5, 64  ;;  %p708_p10 = scmp.lt.u32.totalorder %s1110_s5, %s1373_s0 }
  0x30   : > { %p703_p5 = scmp.ne.s32.totalorder %s1110_s5, %s702_s7  ;;  %p709_p11 = scmp.lt.u32.totalorder %s707_s24, %s702_s7 }
  0x31   : > { %p711_p0 = scmp.lt.u32.totalorder %s702_s7, %s1110_s5 }
  0x32   : > { %p705_p8 = pnand %p704_p6, %p703_p5  ;;  %p710_p13 = por %p709_p11, %p708_p10 }
  0x34   : > { %p706_p9 = pneg %p705_p8  ;;  %p712_p1 = por %p711_p0, %p710_p13 }
  0x36   : > { %p713_p3 = pnand %p712_p1, %p706_p9 }
  0x38   : > { %716 = shalt.err (!%p713_p3)
}
  0x39   : > { %s717_s13 = scalar_lea.vmem %s1102_s10, 64  ;;  %s950_s23 = smov [#allocation2]  }
  0x3a   : > { %p718_p5 = scmp.ne.s32.totalorder %s1102_s10, %s717_s13  ;;  %s722_s9 = sshll.u32 %s950_s23, 4  ;;  %s723_s9 = int_to_ptr.vmem [resolvable:$false] %s722_s9 }
  0x3b   : > { %s724_s29 = scalar_lea.vmem %s723_s9, 128  ;;  %p725_p12 = scmp.lt.s32.totalorder %s1102_s10, %s723_s9 }
  0x3c   : > { %p720_p8 = pnand %p718_p5, %p704_p6  ;;  %p726_p10 = scmp.lt.s32.totalorder %s724_s29, %s717_s13 }
  0x3e   : > { %p721_p2 = pneg %p720_p8  ;;  %p727_p11 = por %p726_p10, %p725_p12 }
  0x40   : > { %p728_p13 = pnand %p727_p11, %p721_p2 }
  0x42   : > { %731 = shalt.err (!%p728_p13)
}
  0x43   : > { %597 = dma.hbm_to_vmem [thread:$0]  (!%p1095_p4), %s1110_s5, 64, %s1102_s10, %s192_s6  }
  0x44   : > { %p229_p3 = scmp.lt.s32.totalorder %s948_s25, 31  ;;  %s1374_s7 = sshll.u32 %s1100_s27, 6 }
  0x45   : > { %s1145_s13 = scalar_lea.hbm %s1349_s1, %s1374_s7  ;;  %p1375_p12 = scmp.ge.s32.totalorder %s948_s25, 1 }
  0x46   : > { %s1377_s9 = sshll.u32 %s1087_s18, 2  ;;  %s212_s5 = scalar_lea.sflag [#allocation6], %s1087_s18 }
  0x47   : > { %p1149_p2 = pnand %p1375_p12, %p229_p3  ;;  %s215_s29 = scalar_lea.vmem [#allocation5], %s1377_s9 }
  0x48   : > { %s224_s0 = sshll.u32 %s215_s29, 4  ;;  %s732_s27 = scalar_lea.hbm %s1145_s13, 64  ;;  %s225_s0 = int_to_ptr.vmem [resolvable:$true] %s224_s0 }
  0x49   : > { %s1376_s23 = scalar_select %p1149_p2, 1, 0 }
  0x4a   : > { %p733_p9 = scmp.ne.s32.totalorder %s1145_s13, %s732_s27  ;;  %s737_s7 = scalar_lea.hbm %s1349_s1, 1920 }
  0x4b   : > { %p738_p5 = scmp.lt.u32.totalorder %s1145_s13, %s1349_s1  ;;  %p739_p8 = scmp.lt.u32.totalorder %s737_s7, %s732_s27 }
  0x4c   : > { %p735_p0 = pnand %p733_p9, %p704_p6  ;;  %p741_p11 = scmp.lt.u32.totalorder %s732_s27, %s1145_s13 }
  0x4d   : > { %p740_p10 = por %p739_p8, %p738_p5 }
  0x4e   : > { %p736_p1 = pneg %p735_p0 }
  0x4f   : > { %p742_p13 = por %p741_p11, %p740_p10 }
  0x51   : > { %p743_p3 = pnand %p742_p13, %p736_p1 }
  0x53   : > { %746 = shalt.err (!%p743_p3)
}
  0x54   : > { %s747_s18 = scalar_lea.vmem %s225_s0, 64  ;;  %s951_s9 = smov [#allocation5]  }
  0x55   : > { %p748_p12 = scmp.ne.s32.totalorder %s225_s0, %s747_s18  ;;  %s752_s29 = sshll.u32 %s951_s9, 4  ;;  %s753_s29 = int_to_ptr.vmem [resolvable:$false] %s752_s29 }
  0x56   : > { %s754_s10 = scalar_lea.vmem %s753_s29, 128  ;;  %p755_p7 = scmp.lt.s32.totalorder %s225_s0, %s753_s29 }
  0x57   : > { %p750_p9 = pnand %p748_p12, %p704_p6  ;;  %p756_p2 = scmp.lt.s32.totalorder %s754_s10, %s747_s18 }
  0x59   : > { %p751_p0 = pneg %p750_p9  ;;  %p757_p5 = por %p756_p2, %p755_p7 }
  0x5b   : > { %p758_p8 = pnand %p757_p5, %p751_p0 }
  0x5d   : > { %761 = shalt.err (!%p758_p8)
}
  0x5e   : > { %600 = dma.hbm_to_vmem [thread:$0]  (!%p1095_p4), %s1145_s13, 64, %s225_s0, %s212_s5  }
  0x5f   : > { %p1378_p1 = scmp.ne.s32.totalorder %s1376_s23, 0 }
  0x60   : > { %s235_s27 = sand.u32 (!%p1378_p1), 1, %s924_s19   ;;  %p1379_p6 = scmp.ne.s32.totalorder (!%p1378_p1), %s1368_s8, 0 }
  0x61   : > { %233 = sbr.rel (%p1378_p1) target bundleno = 210 (0xd2), region = 28  ;;  %s566_s6 = sshll.u32 (!%p1378_p1), %s235_s27, 2 }
  0x62   : > { %s236_s7 = scalar_lea.sflag (!%p1378_p1), [#allocation3], %s235_s27  ;;  %s239_s24 = scalar_lea.vmem (!%p1378_p1), [#allocation2], %s566_s6 }
  0x68   : > { %891 = dma.done.wait (%p1379_p6), %s236_s7, 64  }
  0x69   : > { %893 = vsyncadd (%p1379_p6), %s236_s7, 4294967232  ;;  %s245_s28 = scalar_lea.sflag [#allocation6], %s235_s27  ;;  %s248_s18 = scalar_lea.vmem [#allocation5], %s566_s6 }
  0x6a   : > { %895 = dma.done.wait (%p1379_p6), %s245_s28, 64  }
  0x6b   : > { %897 = vsyncadd (%p1379_p6), %s245_s28, 4294967232  ;;  %s271_s0 = sand.u32 1, %s912_s16   ;;  %p571_p7 = scmp.ne.s32.totalorder %s932_s21, 0 }
  0x6c   : > { %s568_s30 = sshll.u32 %s271_s0, 3  ;;  %v952_v0 = vmov (!%p571_p7), 0.0  }
  0x6d   : > { %s1189_s13 = scalar_lea.vmem [#allocation7], %s568_s30  ;;  %s1191_s23 = scalar_lea.vmem [#allocation8], %s568_s30 }
  0x6e   : > { %s1193_s5 = scalar_lea.vmem [#allocation10], %s568_s30  ;;  %291 = sbr.rel (%p571_p7) target bundleno = 117 (0x75), region = 40  ;;  %292 = vst [vmem:[%s1189_s13] sm:$0xff] (!%p571_p7), %v952_v0  ;;  %293 = vst [vmem:[%s1191_s23] sm:$0xff] (!%p571_p7), %v952_v0 }
  0x6f   : > { %294 = vst [vmem:[%s1193_s5] sm:$0xff] (!%p571_p7), %v952_v0 }
  0x75 PF: > { %v295_v1 = vld [vmem:[%s239_s24] sm:$0xf]  ;;  %v297_v2 = vld [vmem:[%s248_s18] sm:$0xf]  ;;  %p572_p4 = scmp.eq.s32.totalorder %s932_s21, 4 }
  0x76   : > { %v296_v3 = vunpack.c.l.bf16 %v295_v1  ;;  %v298_v4 = vunpack.c.l.bf16 %v297_v2  ;;  %v303_v5 = vld [vmem:[%s1189_s13] sm:$0xff] (!%p572_p4)  ;;  %v308_v7 = vld [vmem:[%s1191_s23] sm:$0xff] (!%p572_p4) }
  0x77   : > { %302 = sbr.rel (%p572_p4) target bundleno = 126 (0x7e), region = 44  ;;  %v312_v8 = vld [vmem:[%s1193_s5] sm:$0xff] (!%p572_p4) }
  0x78   : > { %v304_v6 = vmul.f32 (!%p572_p4), %v298_v4, %v296_v3  ;;  %v310_v9 = vadd.f32 (!%p572_p4), %v308_v7, %v296_v3  ;;  %v314_v10 = vadd.f32 (!%p572_p4), %v312_v8, %v298_v4 }
  0x7a   : > { %v306_v11 = vadd.f32 (!%p572_p4), %v304_v6, %v303_v5  ;;  %311 = vst [vmem:[%s1191_s23] sm:$0xff] (!%p572_p4), %v310_v9  ;;  %315 = vst [vmem:[%s1193_s5] sm:$0xff] (!%p572_p4), %v314_v10 }
  0x7c   : > { %307 = vst [vmem:[%s1189_s13] sm:$0xff] (!%p572_p4), %v306_v11 }
  0x7e PF: > { %p573_p2 = scmp.ne.s32.totalorder %s932_s21, 4 }
  0x7f   : > { %v320_v12 = vlaneseq (!%p573_p2) }
  0x80   : > { %319 = sbr.rel (%p573_p2) target bundleno = 138 (0x8a), region = 48 }
  0x81   : > { %v321_v13 = vshrl.u32 (!%p573_p2), %v320_v12, 7  ;;  %v330_v14 = vld [vmem:[%s1191_s23] sm:$0xff] (!%p573_p2)  ;;  %v334_v15 = vld [vmem:[%s1193_s5] sm:$0xff] (!%p573_p2) }
  0x83   : > { %vm322_vm0 = vcmp.lt.s32.totalorder (!%p573_p2), %v321_v13, 2  ;;  %v325_v18 = vld [vmem:[%s1189_s13] sm:$0xff] (!%p573_p2) }
  0x84   : > { %v323_v16 = vsel (!%p573_p2), %vm322_vm0, %v296_v3, 0.0  ;;  %v324_v17 = vsel (!%p573_p2), %vm322_vm0, %v298_v4, 0.0 }
  0x85   : > { %v326_v19 = vmul.f32 (!%p573_p2), %v324_v17, %v323_v16  ;;  %v332_v20 = vadd.f32 (!%p573_p2), %v330_v14, %v323_v16  ;;  %v336_v21 = vadd.f32 (!%p573_p2), %v334_v15, %v324_v17 }
  0x87   : > { %v328_v22 = vadd.f32 %v326_v19, %v325_v18  ;;  %333 = vst [vmem:[%s1191_s23] sm:$0xff] %v332_v20  ;;  %337 = vst [vmem:[%s1193_s5] sm:$0xff] %v336_v21 }
  0x89   : > { %329 = vst [vmem:[%s1189_s13] sm:$0xff] %v328_v22 }
  0x8a PF: > { %s343_s21 = sand.u32 1, %s1035_s26   ;;  %s1215_s8 = sshll.u32 %s936_s22, 7 }
  0x8b   : > { %s1221_s10 = scalar_lea.hbm %s1351_s3, %s1215_s8  ;;  %s375_s27 = sshll.u32 %s1191_s23, 4  ;;  %s1224_s27 = int_to_ptr.vmem [resolvable:$true] %s375_s27 }
  0x8c   : > { %s1230_s24 = scalar_lea.hbm %s1350_s2, %s1215_s8  ;;  %s1232_s22 = scalar_lea.sflag [#allocation9], %s343_s21 }
  0x8d   : > { %s762_s26 = scalar_lea.vmem %s1224_s27, 128  ;;  %p1380_p11 = scmp.ne.s32.totalorder %s1369_s11, 0 }
  0x8e   : > { %p763_p10 = scmp.ne.s32.totalorder %s1224_s27, %s762_s26  ;;  %s953_s28 = smov [#allocation8]  }
  0x8f   : > { %s766_s18 = sshll.u32 %s953_s28, 4  ;;  %s767_s18 = int_to_ptr.vmem [resolvable:$false] %s766_s18 }
  0x90   : > { %p764_p13 = pnand %p763_p10, %p1380_p11  ;;  %s768_s30 = scalar_lea.vmem %s767_s18, 256 }
  0x91   : > { %p769_p12 = scmp.lt.s32.totalorder %s1224_s27, %s767_s18  ;;  %p770_p9 = scmp.lt.s32.totalorder %s768_s30, %s762_s26 }
  0x92   : > { %p765_p3 = pneg %p764_p13 }
  0x93   : > { %p771_p0 = por %p770_p9, %p769_p12 }
  0x95   : > { %p772_p5 = pnand %p771_p0, %p765_p3 }
  0x97   : > { %775 = shalt.err (!%p772_p5)
}
  0x98   : > { %s776_s23 = scalar_lea.hbm %s1221_s10, 128  ;;  %s780_s29 = scalar_lea.hbm %s1351_s3, 768 }
  0x99   : > { %p777_p8 = scmp.ne.s32.totalorder %s1221_s10, %s776_s23  ;;  %p781_p7 = scmp.lt.u32.totalorder %s1221_s10, %s1351_s3 }
  0x9a   : > { %p782_p4 = scmp.lt.u32.totalorder %s780_s29, %s776_s23  ;;  %p784_p10 = scmp.lt.u32.totalorder %s776_s23, %s1221_s10 }
  0x9b   : > { %p778_p1 = pnand %p777_p8, %p1380_p11 }
  0x9c   : > { %p783_p2 = por %p782_p4, %p781_p7 }
  0x9d   : > { %p779_p6 = pneg %p778_p1 }
  0x9e   : > { %p785_p13 = por %p784_p10, %p783_p2 }
  0xa0   : > { %p786_p3 = pnand %p785_p13, %p779_p6 }
  0xa2   : > { %789 = shalt.err (!%p786_p3)
}
  0xa3   : > { %589 = dma.vmem_to_hbm [thread:$0]  (%p1380_p11), %s1224_s27, 128, %s1221_s10, %s1232_s22  }
  0xa4   : > { %s362_s26 = sshll.u32 %s1189_s13, 4  ;;  %s1261_s30 = scalar_lea.hbm %s1352_s4, %s1215_s8  ;;  %s1263_s26 = int_to_ptr.vmem [resolvable:$true] %s362_s26 }
  0xa5   : > { %s388_s23 = sshll.u32 %s1193_s5, 4  ;;  %s339_s21 = scalar_lea.sflag [#allocation4], %s271_s0  ;;  %s389_s23 = int_to_ptr.vmem [resolvable:$true] %s388_s23 }
  0xa6   : > { %s790_s9 = scalar_lea.vmem %s1263_s26, 128  ;;  %s954_s10 = smov [#allocation7]  }
  0xa7   : > { %p791_p12 = scmp.ne.s32.totalorder %s1263_s26, %s790_s9  ;;  %s794_s13 = sshll.u32 %s954_s10, 4  ;;  %s795_s13 = int_to_ptr.vmem [resolvable:$false] %s794_s13 }
  0xa8   : > { %s796_s27 = scalar_lea.vmem %s795_s13, 256  ;;  %p797_p5 = scmp.lt.s32.totalorder %s1263_s26, %s795_s13 }
  0xa9   : > { %p792_p9 = pnand %p791_p12, %p1380_p11  ;;  %p798_p8 = scmp.lt.s32.totalorder %s796_s27, %s790_s9 }
  0xab   : > { %p793_p0 = pneg %p792_p9  ;;  %p799_p1 = por %p798_p8, %p797_p5 }
  0xad   : > { %p800_p6 = pnand %p799_p1, %p793_p0 }
  0xaf   : > { %803 = shalt.err (!%p800_p6)
}
  0xb0   : > { %s804_s0 = scalar_lea.hbm %s1230_s24, 128  ;;  %s808_s6 = scalar_lea.hbm %s1350_s2, 768 }
  0xb1   : > { %p805_p7 = scmp.ne.s32.totalorder %s1230_s24, %s804_s0  ;;  %p809_p10 = scmp.lt.u32.totalorder %s1230_s24, %s1350_s2 }
  0xb2   : > { %p810_p13 = scmp.lt.u32.totalorder %s808_s6, %s804_s0  ;;  %p812_p12 = scmp.lt.u32.totalorder %s804_s0, %s1230_s24 }
  0xb3   : > { %p806_p4 = pnand %p805_p7, %p1380_p11 }
  0xb4   : > { %p811_p3 = por %p810_p13, %p809_p10 }
  0xb5   : > { %p807_p2 = pneg %p806_p4 }
  0xb6   : > { %p813_p9 = por %p812_p12, %p811_p3 }
  0xb8   : > { %p814_p0 = pnand %p813_p9, %p807_p2 }
  0xba   : > { %817 = shalt.err (!%p814_p0)
}
  0xbb   : > { %588 = dma.vmem_to_hbm [thread:$0]  (%p1380_p11), %s1263_s26, 128, %s1230_s24, %s339_s21  }
  0xbc   : > { %s818_s18 = scalar_lea.vmem %s389_s23, 128  ;;  %s955_s9 = smov [#allocation10]  }
  0xbd   : > { %p819_p5 = scmp.ne.s32.totalorder %s389_s23, %s818_s18  ;;  %s822_s10 = sshll.u32 %s955_s9, 4  ;;  %s823_s10 = int_to_ptr.vmem [resolvable:$false] %s822_s10 }
  0xbe   : > { %s824_s13 = scalar_lea.vmem %s823_s10, 256  ;;  %p825_p6 = scmp.lt.s32.totalorder %s389_s23, %s823_s10 }
  0xbf   : > { %p820_p8 = pnand %p819_p5, %p1380_p11  ;;  %p826_p7 = scmp.lt.s32.totalorder %s824_s13, %s818_s18 }
  0xc1   : > { %p821_p1 = pneg %p820_p8  ;;  %p827_p4 = por %p826_p7, %p825_p6 }
  0xc3   : > { %p828_p2 = pnand %p827_p4, %p821_p1 }
  0xc5   : > { %831 = shalt.err (!%p828_p2)
}
  0xc6   : > { %s832_s5 = scalar_lea.hbm %s1261_s30, 128  ;;  %s836_s21 = scalar_lea.hbm %s1352_s4, 768 }
  0xc7   : > { %p833_p10 = scmp.ne.s32.totalorder %s1261_s30, %s832_s5  ;;  %p837_p12 = scmp.lt.u32.totalorder %s1261_s30, %s1352_s4 }
  0xc8   : > { %p838_p9 = scmp.lt.u32.totalorder %s836_s21, %s832_s5  ;;  %p840_p5 = scmp.lt.u32.totalorder %s832_s5, %s1261_s30 }
  0xc9   : > { %p834_p13 = pnand %p833_p10, %p1380_p11 }
  0xca   : > { %p839_p0 = por %p838_p9, %p837_p12 }
  0xcb   : > { %p835_p3 = pneg %p834_p13 }
  0xcc   : > { %p841_p8 = por %p840_p5, %p839_p0 }
  0xce   : > { %p842_p1 = pnand %p841_p8, %p835_p3 }
  0xd0   : > { %845 = shalt.err (!%p842_p1)
}
  0xd1   : > { %590 = dma.vmem_to_hbm [thread:$0]  (%p1380_p11), %s389_s23, 128, %s1261_s30, %s1232_s22  }
  0xd2 PF: > { %p612_p6 = scmp.ge.s32.totalorder %s948_s25, 2  ;;  %s400_s8 = sand.u32 1, %s908_s15  }
  0xd3   : > { %p1381_p7 = scmp.ne.s32.totalorder %s1371_s14, 0  ;;  %s401_s29 = scalar_lea.sflag [#allocation4], %s400_s8 }
  0xd5   : > { %p602_p4 = pnand %p612_p6, %p1381_p7 }
  0xd7   : > { %899 = dma.done.wait (!%p602_p4), %s401_s29, 128  }
  0xd8   : > { %901 = vsyncadd (!%p602_p4), %s401_s29, 4294967168  ;;  %s1382_s6 = sadd.s32 4294967294, %s948_s25  }
  0xd9   : > { %s409_s7 = sand.u32 1, %s1382_s6  }
  0xda   : > { %s410_s28 = scalar_lea.sflag [#allocation9], %s409_s7 }
  0xdb   : > { %903 = dma.done.wait (!%p602_p4), %s410_s28, 256  }
  0xdc   : > { %905 = vsyncadd (!%p602_p4), %s410_s28, 4294967040  ;;  %s27_s25 = sadd.s32 1, %s948_s25   ;;  %s1383_s11 = sld [smem:[#allocation19_spill]] }
  0xdd   : > { %p24_p11 = scmp.ge.s32.totalorder %s27_s25, 32   ;;  %s1384_s21 = sld [smem:[#allocation15_spill]] }
  0xde   : > { %s1385_s22 = sld [smem:[#allocation16_spill]]  ;;  %s1386_s23 = sld [smem:[#allocation17_spill]] }
  0xdf   : > { %s1387_s24 = sld [smem:[#allocation18_spill]]  ;;  %s1388_s15 = smov %s912_s16 }
  0xe0   : > { %s1389_s16 = smov %s916_s17  ;;  %s1390_s17 = smov %s1072_s12 }
  0xe1   : > { %s1391_s18 = smov %s924_s19  ;;  %s1392_s19 = smov %s928_s20 }
  0xe2   : > { %s1393_s20 = smov %s1383_s11  ;;  %26 = sbr.rel (!%p24_p11) target bundleno = 15 (0xf), region = 130 }
  0xe9   :  { %424 = vsyncpa [#allocation3], 1 }
  0xea   :  { %426 = vsyncpa [#allocation3 + $0x1], 1 }
  0xeb   :  { %427 = vsyncpa [#allocation6], 1 }
  0xec   :  { %429 = vsyncpa [#allocation6 + $0x1], 1 }
  0xed   :  { %430 = vsyncpa [#allocation4], 1 }
  0xee   :  { %432 = vsyncpa [#allocation4 + $0x1], 1 }
  0xef   :  { %433 = vsyncpa [#allocation9], 1 }
  0xf0   :  { %435 = vsyncpa [#allocation9 + $0x1], 1 }

</bundles_post_ra>
